<compile_context>
chip_gen: v7x
topology: tpu7x:2x2x1
jax: 0.10.0
libtpu: 0.0.40
codegen_flags: <defaults>
</compile_context>

<pallas_src>
import functools
import math

import jax
import jax.numpy as jnp
from jax.experimental import pallas as pl
from jax.experimental.pallas import tpu as pltpu

SCALING_FACTOR = 16
BN_EPS = 1e-5


# --------------------------------------------------------------------------- #
# VMEM sizing helpers
# --------------------------------------------------------------------------- #
def _vmem_ceiling_bytes():
    try:
        info = pltpu.get_tpu_info()
        return int(getattr(info, "vmem_capacity_bytes", 64 * 1024 * 1024))
    except Exception:
        return 64 * 1024 * 1024  # conservative (v7x physical)


def _fused_vmem_limit_bytes(B, Ds, Da, H1, H2, Dout):
    f32 = 4
    io = (B * (Ds + Da + Dout)
          + (Ds + Da) * H1 + H1 * H2 + H2 * Dout
          + 4 * (H1 + H2) + Dout) * f32
    act = 4 * B * (H1 + H2) * f32              # h1/h2 + live temporaries headroom
    limit = io + act + (8 << 20)
    limit = max(limit, 32 * 1024 * 1024)
    limit = min(limit, int(0.85 * _vmem_ceiling_bytes()))
    return int(limit)


# --------------------------------------------------------------------------- #
# Single-block fused path (small / moderate batch)
# --------------------------------------------------------------------------- #
def _critic_fused_kernel(s_ref, a_ref, w1s_ref, w1a_ref, g1_ref, b1_ref,
                         w2_ref, g2_ref, b2_ref, w3_ref, b3_ref, out_ref):
    # fc1 — concat fused via pre-split weights (no unaligned VMEM sublane slice).
    h1 = (jnp.dot(s_ref[...], w1s_ref[...], preferred_element_type=jnp.float32)
          + jnp.dot(a_ref[...], w1a_ref[...], preferred_element_type=jnp.float32))

    # bn1 + relu: shifted two-pass batch stats (numerically safe, matches PyTorch),
    # then folded scale/shift FMA + ReLU on the (B,H1) tensor.
    m1 = jnp.mean(h1, axis=0, keepdims=True)
    d1 = h1 - m1
    v1 = jnp.mean(d1 * d1, axis=0, keepdims=True)
    scale1 = g1_ref[...] * jax.lax.rsqrt(v1 + BN_EPS)
    h1n = jnp.maximum(d1 * scale1 + b1_ref[...], 0.0)

    # fc2 + bn2 + relu
    h2 = jnp.dot(h1n, w2_ref[...], preferred_element_type=jnp.float32)
    m2 = jnp.mean(h2, axis=0, keepdims=True)
    d2 = h2 - m2
    v2 = jnp.mean(d2 * d2, axis=0, keepdims=True)
    scale2 = g2_ref[...] * jax.lax.rsqrt(v2 + BN_EPS)
    h2n = jnp.maximum(d2 * scale2 + b2_ref[...], 0.0)

    # fc3 (output last-dim < 128 -> masked stores; dictated by module semantics)
    out_ref[...] = (jnp.dot(h2n, w3_ref[...], preferred_element_type=jnp.float32)
                    + b3_ref[...])


def critic_forward_fused(state, action, params):
    """state: (B, Ds), action: (B, Da) -> (B, output_size). Single VMEM block."""
    w1, g1, b1, w2, g2, b2, w3, b3 = params
    state = state.astype(jnp.float32)
    action = action.astype(jnp.float32)
    B, Ds = state.shape
    Da = action.shape[1]
    H1 = w1.shape[1]
    H2 = w2.shape[1]
    Dout = w3.shape[1]

    # Pre-split W1 in the wrapper so the kernel never slices a VMEM tile at a
    # non-8-aligned sublane offset (Ds=6).  These are static XLA slices.
    w1s = w1[:Ds, :]
    w1a = w1[Ds:, :]

    vmem = pl.BlockSpec(memory_space=pltpu.MemorySpace.VMEM)
    return pl.pallas_call(
        _critic_fused_kernel,
        out_shape=jax.ShapeDtypeStruct((B, Dout), jnp.float32),
        in_specs=[vmem] * 11,
        out_specs=vmem,
        compiler_params=pltpu.CompilerParams(
            vmem_limit_bytes=_fused_vmem_limit_bytes(B, Ds, Da, H1, H2, Dout)),
    )(state, action, w1s, w1a, g1, b1, w2, g2, b2, w3, b3)


# --------------------------------------------------------------------------- #
# Batch-tiled two-pass-BN path (large batch / v7x)
# --------------------------------------------------------------------------- #
def _tiled_fc1_kernel(s_ref, a_ref, w1s_ref, w1a_ref, h1_ref, sum1_ref, sq1_ref):
    h1 = (jnp.dot(s_ref[...], w1s_ref[...], preferred_element_type=jnp.float32)
          + jnp.dot(a_ref[...], w1a_ref[...], preferred_element_type=jnp.float32))
    h1_ref[...] = h1

    @pl.when(pl.program_id(0) == 0)
    def _():
        sum1_ref[...] = jnp.zeros_like(sum1_ref)
        sq1_ref[...] = jnp.zeros_like(sq1_ref)

    # TODO(synk): for batch tiles >~2K rows, move these axis-0 reductions onto the
    # MXU (ones(1,TB) @ h) to free XLU/VPU slots; at TB<=1024 they are noise.
    sum1_ref[...] += jnp.sum(h1, axis=0, keepdims=True)
    sq1_ref[...] += jnp.sum(h1 * h1, axis=0, keepdims=True)


def _tiled_fc2_kernel(h1_ref, scale1_ref, shift1_ref, w2_ref,
                      h2_ref, sum2_ref, sq2_ref):
    h1n = jnp.maximum(h1_ref[...] * scale1_ref[...] + shift1_ref[...], 0.0)
    h2 = jnp.dot(h1n, w2_ref[...], preferred_element_type=jnp.float32)
    h2_ref[...] = h2

    @pl.when(pl.program_id(0) == 0)
    def _():
        sum2_ref[...] = jnp.zeros_like(sum2_ref)
        sq2_ref[...] = jnp.zeros_like(sq2_ref)

    sum2_ref[...] += jnp.sum(h2, axis=0, keepdims=True)
    sq2_ref[...] += jnp.sum(h2 * h2, axis=0, keepdims=True)


def _tiled_fc3_kernel(h2_ref, scale2_ref, shift2_ref, w3_ref, b3_ref, out_ref):
    h2n = jnp.maximum(h2_ref[...] * scale2_ref[...] + shift2_ref[...], 0.0)
    out_ref[...] = (jnp.dot(h2n, w3_ref[...], preferred_element_type=jnp.float32)
                    + b3_ref[...])


def _stats_to_scale_shift(sums, sumsq, gamma, beta, n):
    """Fold BN into per-feature scale/shift from accumulated sum / sum-of-squares."""
    mean = sums / n
    var = jnp.maximum(sumsq / n - mean * mean, 0.0)
    # TODO(synk): switch to a Welford/Chan per-tile combine if activation means get
    # large enough for E[x^2]-E[x]^2 cancellation to matter in f32.
    scale = gamma * jax.lax.rsqrt(var + BN_EPS)
    shift = beta - mean * scale
    return scale, shift


def critic_forward_tiled(state, action, params, *, batch_tile):
    """Batch-tiled forward: grid=(B//TB,) per stage; stats accumulated over an
    'arbitrary' axis, normalize/fc3 pass is 'parallel' (both TCs on v7x).
    Bounds VMEM to ~tile-sized buffers instead of the full batch."""
    w1, g1, b1, w2, g2, b2, w3, b3 = params
    state = state.astype(jnp.float32)
    action = action.astype(jnp.float32)
    B, Ds = state.shape
    Da = action.shape[1]
    H1 = w1.shape[1]
    H2 = w2.shape[1]
    Dout = w3.shape[1]
    TB = batch_tile
    assert B % TB == 0, "batch must be divisible by batch_tile"
    nT = B // TB

    w1s = w1[:Ds, :]
    w1a = w1[Ds:, :]

    rows = lambda i: (i, 0)
    fixed = lambda i: (0, 0)

    # ---- stage 1: fc1 per tile + accumulate batch sum / sum-of-squares -------
    h1, s1, q1 = pl.pallas_call(
        _tiled_fc1_kernel,
        grid=(nT,),
        out_shape=(jax.ShapeDtypeStruct((B, H1), jnp.float32),
                   jax.ShapeDtypeStruct((1, H1), jnp.float32),
                   jax.ShapeDtypeStruct((1, H1), jnp.float32)),
        in_specs=[pl.BlockSpec((TB, Ds), rows),
                  pl.BlockSpec((TB, Da), rows),
                  pl.BlockSpec((Ds, H1), fixed),
                  pl.BlockSpec((Da, H1), fixed)],
        out_specs=(pl.BlockSpec((TB, H1), rows),
                   pl.BlockSpec((1, H1), fixed),
                   pl.BlockSpec((1, H1), fixed)),
        compiler_params=pltpu.CompilerParams(
            dimension_semantics=("arbitrary",)),
    )(state, action, w1s, w1a)
    scale1, shift1 = _stats_to_scale_shift(s1, q1, g1, b1, B)

    # ---- stage 2: normalize h1 + fc2 per tile + accumulate h2 stats ----------
    h2, s2, q2 = pl.pallas_call(
        _tiled_fc2_kernel,
        grid=(nT,),
        out_shape=(jax.ShapeDtypeStruct((B, H2), jnp.float32),
                   jax.ShapeDtypeStruct((1, H2), jnp.float32),
                   jax.ShapeDtypeStruct((1, H2), jnp.float32)),
        in_specs=[pl.BlockSpec((TB, H1), rows),
                  pl.BlockSpec((1, H1), fixed),
                  pl.BlockSpec((1, H1), fixed),
                  pl.BlockSpec((H1, H2), fixed)],
        out_specs=(pl.BlockSpec((TB, H2), rows),
                   pl.BlockSpec((1, H2), fixed),
                   pl.BlockSpec((1, H2), fixed)),
        compiler_params=pltpu.CompilerParams(
            dimension_semantics=("arbitrary",)),
    )(h1, scale1, shift1, w2)
    scale2, shift2 = _stats_to_scale_shift(s2, q2, g2, b2, B)

    # ---- stage 3: normalize h2 + fc3 (fully parallel across tiles / TCs) -----
    out = pl.pallas_call(
        _tiled_fc3_kernel,
        grid=(nT,),
        out_shape=jax.ShapeDtypeStruct((B, Dout), jnp.float32),
        in_specs=[pl.BlockSpec((TB, H2), rows),
                  pl.BlockSpec((1, H2), fixed),
                  pl.BlockSpec((1, H2), fixed),
                  pl.BlockSpec((H2, Dout), fixed),
                  pl.BlockSpec((1, Dout), fixed)],
        out_specs=pl.BlockSpec((TB, Dout), rows),
        compiler_params=pltpu.CompilerParams(
            dimension_semantics=("parallel",)),
    )(h2, scale2, shift2, w3, b3)
    return out


# --------------------------------------------------------------------------- #
# Dispatch
# --------------------------------------------------------------------------- #
def _pick_batch_tile(B):
    for tb in (1024, 512, 256, 128):
        if B % tb == 0 and B > tb:
            return tb
    return None


def critic_forward(state, action, params):
    """Small batches -> single fused block; large batches -> batch-tiled pipeline.

    NOTE(amortization): if this critic is evaluated many times on tiny batches in an
    RL inner loop, stack minibatches along the batch axis into one call — at B=8
    every dimension is lane/sublane padding and the call is pure launch overhead.
    """
    B = state.shape[0]
    tb = _pick_batch_tile(B)
    if tb is not None and B >= 2048:
        return critic_forward_tiled(state, action, params, batch_tile=tb)
    return critic_forward_fused(state, action, params)


# --------------------------------------------------------------------------- #
# Params / reference
# --------------------------------------------------------------------------- #
def init_params(key, input_size, output_size):
    """PyTorch-style Linear init U(-1/sqrt(fan_in), 1/sqrt(fan_in)); weights stored
    as (in, out).  fc1/fc2 biases are intentionally NOT created: under training-mode
    BatchNorm a per-feature constant bias is cancelled by the mean subtraction and
    does not change the variance, so the forward output is identical without them."""
    h1 = SCALING_FACTOR * input_size
    h2 = SCALING_FACTOR * output_size

    def linear_w(key, fan_in, fan_out):
        bound = 1.0 / math.sqrt(fan_in)
        return jax.random.uniform(key, (fan_in, fan_out), jnp.float32, -bound, bound)

    k1, k2, k3, kb3 = jax.random.split(key, 4)
    w1 = linear_w(k1, input_size, h1)
    w2 = linear_w(k2, h1, h2)
    w3 = linear_w(k3, h2, output_size)
    bound3 = 1.0 / math.sqrt(h2)
    b3 = jax.random.uniform(kb3, (1, output_size), jnp.float32, -bound3, bound3)

    g1 = jnp.ones((1, h1), jnp.float32)
    be1 = jnp.zeros((1, h1), jnp.float32)
    g2 = jnp.ones((1, h2), jnp.float32)
    be2 = jnp.zeros((1, h2), jnp.float32)
    return (w1, g1, be1, w2, g2, be2, w3, b3)


def critic_reference(state, action, params):
    """Pure-JAX reference matching PyTorch Critic_ forward (train-mode BN)."""
    w1, g1, b1, w2, g2, b2, w3, b3 = params
    x = jnp.concatenate([state, action], axis=1).astype(jnp.float32)

    h1 = x @ w1
    m1 = h1.mean(axis=0)
    v1 = ((h1 - m1) ** 2).mean(axis=0)          # biased variance (PyTorch BN)
    h1 = jnp.maximum((h1 - m1) / jnp.sqrt(v1 + BN_EPS) * g1 + b1, 0.0)

    h2 = h1 @ w2
    m2 = h2.mean(axis=0)
    v2 = ((h2 - m2) ** 2).mean(axis=0)
    h2 = jnp.maximum((h2 - m2) / jnp.sqrt(v2 + BN_EPS) * g2 + b2, 0.0)

    return h2 @ w3 + b3


# --------------------------------------------------------------------------- #
# Demo / self-test
# --------------------------------------------------------------------------- #
if __name__ == "__main__":
    state_dim, action_dim = 6, 2
    input_size = state_dim + action_dim          # fc1 expects the concatenated size
    output_size = 2

    key = jax.random.PRNGKey(0)
    ks1, ka1, kp, ks2, ka2 = jax.random.split(key, 5)
    params = init_params(kp, input_size, output_size)

    # 1) small-batch fused single-block path
    B = 8
    state = jax.random.normal(ks1, (B, state_dim), jnp.float32)
    action = jax.random.normal(ka1, (B, action_dim), jnp.float32)
    fused_fn = jax.jit(critic_forward_fused)
    out = fused_fn(state, action, params)
    jax.block_until_ready(out)
    assert out.shape == (B, output_size)
    ref = critic_reference(state, action, params)
    assert jnp.allclose(out, ref, atol=1e-3, rtol=1e-3), (
        f"fused mismatch: max abs diff {jnp.max(jnp.abs(out - ref))}")

    # 2) batch-tiled two-pass-BN path (the large-batch / v7x route), modest shapes
    B2, TB = 256, 128
    state2 = jax.random.normal(ks2, (B2, state_dim), jnp.float32)
    action2 = jax.random.normal(ka2, (B2, action_dim), jnp.float32)
    tiled_fn = jax.jit(functools.partial(critic_forward_tiled, batch_tile=TB))
    out2 = tiled_fn(state2, action2, params)
    jax.block_until_ready(out2)
    assert out2.shape == (B2, output_size)
    ref2 = critic_reference(state2, action2, params)
    assert jnp.allclose(out2, ref2, atol=2e-3, rtol=2e-3), (
        f"tiled mismatch: max abs diff {jnp.max(jnp.abs(out2 - ref2))}")

    print("KERNEL_OK")
</pallas_src>

<mosaic_0001>
module attributes {stable_mosaic.version = 11 : i64} {
  func.func @_critic_fused_kernel(%arg0: memref<8x6xf32, #tpu.memory_space<vmem>>, %arg1: memref<8x2xf32, #tpu.memory_space<vmem>>, %arg2: memref<6x128xf32, #tpu.memory_space<vmem>>, %arg3: memref<2x128xf32, #tpu.memory_space<vmem>>, %arg4: memref<1x128xf32, #tpu.memory_space<vmem>>, %arg5: memref<1x128xf32, #tpu.memory_space<vmem>>, %arg6: memref<128x32xf32, #tpu.memory_space<vmem>>, %arg7: memref<1x32xf32, #tpu.memory_space<vmem>>, %arg8: memref<1x32xf32, #tpu.memory_space<vmem>>, %arg9: memref<32x2xf32, #tpu.memory_space<vmem>>, %arg10: memref<1x2xf32, #tpu.memory_space<vmem>>, %arg11: memref<8x2xf32, #tpu.memory_space<vmem>>) attributes {dimension_semantics = [], scalar_prefetch = 0 : i64, scratch_operands = 0 : i64, tpu.core_type = #tpu.core_type<tc>} {
    %c0 = arith.constant 0 : index
    %c0_0 = arith.constant 0 : index
    %0 = vector.load %arg0[%c0, %c0_0] : memref<8x6xf32, #tpu.memory_space<vmem>>, vector<8x6xf32>
    %c0_1 = arith.constant 0 : index
    %c0_2 = arith.constant 0 : index
    %1 = vector.load %arg2[%c0_1, %c0_2] : memref<6x128xf32, #tpu.memory_space<vmem>>, vector<6x128xf32>
    %cst = arith.constant dense<0.000000e+00> : vector<8x128xf32>
    %2 = tpu.matmul %0, %1, %cst {dimension_numbers = #tpu.dot_dimension_numbers<[1], [0], [0], [1], [0, 0, 1, 1], [], []>} : vector<8x6xf32>, vector<6x128xf32>, vector<8x128xf32> -> vector<8x128xf32>
    %c0_3 = arith.constant 0 : index
    %c0_4 = arith.constant 0 : index
    %3 = vector.load %arg1[%c0_3, %c0_4] : memref<8x2xf32, #tpu.memory_space<vmem>>, vector<8x2xf32>
    %c0_5 = arith.constant 0 : index
    %c0_6 = arith.constant 0 : index
    %4 = vector.load %arg3[%c0_5, %c0_6] : memref<2x128xf32, #tpu.memory_space<vmem>>, vector<2x128xf32>
    %cst_7 = arith.constant dense<0.000000e+00> : vector<8x128xf32>
    %5 = tpu.matmul %3, %4, %cst_7 {dimension_numbers = #tpu.dot_dimension_numbers<[1], [0], [0], [1], [0, 0, 1, 1], [], []>} : vector<8x2xf32>, vector<2x128xf32>, vector<8x128xf32> -> vector<8x128xf32>
    %6 = arith.addf %2, %5 : vector<8x128xf32>
    %cst_8 = arith.constant dense<0.000000e+00> : vector<128xf32>
    %7 = vector.multi_reduction <add>, %6, %cst_8 [0] : vector<8x128xf32> to vector<128xf32>
    %8 = vector.shape_cast %7 : vector<128xf32> to vector<1x128xf32>
    %cst_9 = arith.constant 8.000000e+00 : f32
    %9 = vector.broadcast %cst_9 : f32 to vector<1x128xf32>
    %10 = arith.divf %8, %9 : vector<1x128xf32>
    %11 = vector.broadcast %10 : vector<1x128xf32> to vector<8x128xf32>
    %12 = arith.subf %6, %11 : vector<8x128xf32>
    %13 = arith.mulf %12, %12 : vector<8x128xf32>
    %cst_10 = arith.constant dense<0.000000e+00> : vector<128xf32>
    %14 = vector.multi_reduction <add>, %13, %cst_10 [0] : vector<8x128xf32> to vector<128xf32>
    %15 = vector.shape_cast %14 : vector<128xf32> to vector<1x128xf32>
    %cst_11 = arith.constant 8.000000e+00 : f32
    %16 = vector.broadcast %cst_11 : f32 to vector<1x128xf32>
    %17 = arith.divf %15, %16 : vector<1x128xf32>
    %c0_12 = arith.constant 0 : index
    %c0_13 = arith.constant 0 : index
    %18 = vector.load %arg4[%c0_12, %c0_13] : memref<1x128xf32, #tpu.memory_space<vmem>>, vector<1x128xf32>
    %cst_14 = arith.constant 9.99999974E-6 : f32
    %19 = vector.broadcast %cst_14 : f32 to vector<1x128xf32>
    %20 = arith.addf %17, %19 : vector<1x128xf32>
    %21 = math.rsqrt %20 : vector<1x128xf32>
    %22 = arith.mulf %18, %21 : vector<1x128xf32>
    %23 = vector.broadcast %22 : vector<1x128xf32> to vector<8x128xf32>
    %24 = arith.mulf %12, %23 : vector<8x128xf32>
    %c0_15 = arith.constant 0 : index
    %c0_16 = arith.constant 0 : index
    %25 = vector.load %arg5[%c0_15, %c0_16] : memref<1x128xf32, #tpu.memory_space<vmem>>, vector<1x128xf32>
    %26 = vector.broadcast %25 : vector<1x128xf32> to vector<8x128xf32>
    %27 = arith.addf %24, %26 : vector<8x128xf32>
    %cst_17 = arith.constant 0.000000e+00 : f32
    %28 = vector.broadcast %cst_17 : f32 to vector<8x128xf32>
    %29 = arith.maximumf %27, %28 : vector<8x128xf32>
    %c0_18 = arith.constant 0 : index
    %c0_19 = arith.constant 0 : index
    %30 = vector.load %arg6[%c0_18, %c0_19] : memref<128x32xf32, #tpu.memory_space<vmem>>, vector<128x32xf32>
    %cst_20 = arith.constant dense<0.000000e+00> : vector<8x32xf32>
    %31 = tpu.matmul %29, %30, %cst_20 {dimension_numbers = #tpu.dot_dimension_numbers<[1], [0], [0], [1], [0, 0, 1, 1], [], []>} : vector<8x128xf32>, vector<128x32xf32>, vector<8x32xf32> -> vector<8x32xf32>
    %cst_21 = arith.constant dense<0.000000e+00> : vector<32xf32>
    %32 = vector.multi_reduction <add>, %31, %cst_21 [0] : vector<8x32xf32> to vector<32xf32>
    %33 = vector.shape_cast %32 : vector<32xf32> to vector<1x32xf32>
    %cst_22 = arith.constant 8.000000e+00 : f32
    %34 = vector.broadcast %cst_22 : f32 to vector<1x32xf32>
    %35 = arith.divf %33, %34 : vector<1x32xf32>
    %36 = vector.broadcast %35 : vector<1x32xf32> to vector<8x32xf32>
    %37 = arith.subf %31, %36 : vector<8x32xf32>
    %38 = arith.mulf %37, %37 : vector<8x32xf32>
    %cst_23 = arith.constant dense<0.000000e+00> : vector<32xf32>
    %39 = vector.multi_reduction <add>, %38, %cst_23 [0] : vector<8x32xf32> to vector<32xf32>
    %40 = vector.shape_cast %39 : vector<32xf32> to vector<1x32xf32>
    %cst_24 = arith.constant 8.000000e+00 : f32
    %41 = vector.broadcast %cst_24 : f32 to vector<1x32xf32>
    %42 = arith.divf %40, %41 : vector<1x32xf32>
    %c0_25 = arith.constant 0 : index
    %c0_26 = arith.constant 0 : index
    %43 = vector.load %arg7[%c0_25, %c0_26] : memref<1x32xf32, #tpu.memory_space<vmem>>, vector<1x32xf32>
    %cst_27 = arith.constant 9.99999974E-6 : f32
    %44 = vector.broadcast %cst_27 : f32 to vector<1x32xf32>
    %45 = arith.addf %42, %44 : vector<1x32xf32>
    %46 = math.rsqrt %45 : vector<1x32xf32>
    %47 = arith.mulf %43, %46 : vector<1x32xf32>
    %48 = vector.broadcast %47 : vector<1x32xf32> to vector<8x32xf32>
    %49 = arith.mulf %37, %48 : vector<8x32xf32>
    %c0_28 = arith.constant 0 : index
    %c0_29 = arith.constant 0 : index
    %50 = vector.load %arg8[%c0_28, %c0_29] : memref<1x32xf32, #tpu.memory_space<vmem>>, vector<1x32xf32>
    %51 = vector.broadcast %50 : vector<1x32xf32> to vector<8x32xf32>
    %52 = arith.addf %49, %51 : vector<8x32xf32>
    %cst_30 = arith.constant 0.000000e+00 : f32
    %53 = vector.broadcast %cst_30 : f32 to vector<8x32xf32>
    %54 = arith.maximumf %52, %53 : vector<8x32xf32>
    %c0_31 = arith.constant 0 : index
    %c0_32 = arith.constant 0 : index
    %55 = vector.load %arg9[%c0_31, %c0_32] : memref<32x2xf32, #tpu.memory_space<vmem>>, vector<32x2xf32>
    %cst_33 = arith.constant dense<0.000000e+00> : vector<8x2xf32>
    %56 = tpu.matmul %54, %55, %cst_33 {dimension_numbers = #tpu.dot_dimension_numbers<[1], [0], [0], [1], [0, 0, 1, 1], [], []>} : vector<8x32xf32>, vector<32x2xf32>, vector<8x2xf32> -> vector<8x2xf32>
    %c0_34 = arith.constant 0 : index
    %c0_35 = arith.constant 0 : index
    %57 = vector.load %arg10[%c0_34, %c0_35] : memref<1x2xf32, #tpu.memory_space<vmem>>, vector<1x2xf32>
    %58 = vector.broadcast %57 : vector<1x2xf32> to vector<8x2xf32>
    %59 = arith.addf %56, %58 : vector<8x2xf32>
    %c0_36 = arith.constant 0 : index
    %c0_37 = arith.constant 0 : index
    %60 = vector.load %arg11[%c0_36, %c0_37] : memref<8x2xf32, #tpu.memory_space<vmem>>, vector<8x2xf32>
    tpu.vector_store %arg11[%c0_36, %c0_37], %59 {strides = array<i32>} : memref<8x2xf32, #tpu.memory_space<vmem>>, vector<8x2xf32>,
    return
  }
}

</mosaic_0001>

<bundles_post_ra>
// kernel: critic_forward_fused.1
= control target key start
LH: loop header
LB: loop body
LE: loop exit
PB: predicated region body
PF: predicated region fallthrough
CT: control target
= control target key end

     0   :  { %vm46_vm0 = vcmask 1041408   ;;  %vm42_vm1 = vcmask 15360   ;;  %v578_v0 = vmov 0.0   ;;  %vm579_vm2 = vmmov 0   ;;  %s746_s3 = inlined_call_operand.vmem [shape: f32[2,128], index: 3, kind: input, shape index: {}]   ;;  %s747_s1 = inlined_call_operand.vmem [shape: f32[8,2], index: 1, kind: input, shape index: {}]   ;;  %s748_s2 = inlined_call_operand.vmem [shape: f32[6,128], index: 2, kind: input, shape index: {}]   ;;  %s749_s0 = inlined_call_operand.vmem [shape: f32[8,6], index: 0, kind: input, shape index: {}]   ;;  %s750_s6 = inlined_call_operand.vmem [shape: f32[128,32], index: 6, kind: input, shape index: {}]   ;;  %s751_s4 = inlined_call_operand.vmem [shape: f32[1,128], index: 4, kind: input, shape index: {}]   ;;  %s752_s5 = inlined_call_operand.vmem [shape: f32[1,128], index: 5, kind: input, shape index: {}]   ;;  %s753_s9 = inlined_call_operand.vmem [shape: f32[32,2], index: 9, kind: input, shape index: {}]   ;;  %s754_s7 = inlined_call_operand.vmem [shape: f32[1,32], index: 7, kind: input, shape index: {}]   ;;  %s755_s8 = inlined_call_operand.vmem [shape: f32[1,32], index: 8, kind: input, shape index: {}]   ;;  %s756_s10 = inlined_call_operand.vmem [shape: f32[1,2], index: 10, kind: input, shape index: {}]   ;;  %s757_s11 = inlined_call_operand.vmem [shape: f32[8,2], index: 11, kind: output, shape index: {}]  }
   0x1   :  { %483 = vmatprep.subr.mxu0 %v578_v0  ;;  %v41_v1 = vld [vmem:[%s746_s3] sm:$0x3]  ;;  %485 = vmatprep.mubr.msk.f32.mxu0 %vm579_vm2, %v578_v0  ;;  %vm124_vm3 = vcmask 1045504   ;;  %vm120_vm4 = vcmask 48128   ;;  %v236_v6 = vld [vmem:[%s750_s6 + $0x8] sm:$0xff]  ;;  %v580_v8 = vmov 0.0|0.0   ;;  %v220_v49 = vlaneseq }
   0x2   :  { %v40_v2 = vld [vmem:[%s747_s1] sm:$0xff]  ;;  %484 = vmatpush3.msk.msra.mxu0 %vm46_vm0, %v41_v1  ;;  %525 = vmatprep.mubr.msk.f32.mxu1 %vm579_vm2, %v578_v0  ;;  %v237_v9 = vld [vmem:[%s750_s6 + $0x10] sm:$0xff]  ;;  %v238_v10 = vld [vmem:[%s750_s6 + $0x18] sm:$0xff]  ;;  %vm321_vm5 = vcmask 261120  }
   0x3   :  { %v39_v3 = vld [vmem:[%s748_s2] sm:$0x3f]  ;;  %486 = vmatmul.mubr.msk.f32.vlgmr.msra.gmra.mrb[0].mxu0 %vm42_vm1, %v40_v2  ;;  %488 = vmatprep.subr.mxu0 %v578_v0  ;;  %v543_v11 = vpack.c.bf16 %v238_v10, %v237_v9  ;;  %v240_v13 = vld [vmem:[%s750_s6 + $0x28] sm:$0xff]  ;;  %v241_v15 = vld [vmem:[%s750_s6 + $0x30] sm:$0xff]  ;;  %v221_v50 = vshrl.u32 %v220_v49, 7 }
   0x4   :  { %489 = vmatpush3.msk.msra.mxu0 %vm124_vm3, %v39_v3  ;;  %490 = vmatprep.mubr.msk.f32.mxu0 %vm579_vm2, %v578_v0  ;;  %v38_v4 = vld [vmem:[%s749_s0] sm:$0xff]  ;;  %v242_v16 = vld [vmem:[%s750_s6 + $0x38] sm:$0xff]  ;;  %v244_v19 = vld [vmem:[%s750_s6 + $0x48] sm:$0xff] }
   0x5   :  { %v235_v5 = vld [vmem:[%s750_s6] sm:$0xff]  ;;  %539 = vmatprep.subr.bf16.mxu1 %v580_v8  ;;  %563 = vmatprep.subr.bf16.mxu0 %v580_v8  ;;  %v549_v17 = vpack.c.bf16 %v242_v16, %v241_v15  ;;  %v245_v21 = vld [vmem:[%s750_s6 + $0x50] sm:$0xff]  ;;  %v246_v22 = vld [vmem:[%s750_s6 + $0x58] sm:$0xff]  ;;  %v222_v52 = vsub.s32 0, %v221_v50 }
   0x6   :  { %v540_v7 = vpack.c.bf16 %v236_v6, %v235_v5  ;;  %v239_v12 = vld [vmem:[%s750_s6 + $0x20] sm:$0xff]  ;;  %v555_v23 = vpack.c.bf16 %v246_v22, %v245_v21  ;;  %v248_v25 = vld [vmem:[%s750_s6 + $0x68] sm:$0xff]  ;;  %v249_v27 = vld [vmem:[%s750_s6 + $0x70] sm:$0xff] }
   0x7   :  { %v546_v14 = vpack.c.bf16 %v240_v13, %v239_v12  ;;  %v243_v18 = vld [vmem:[%s750_s6 + $0x40] sm:$0xff]  ;;  %v250_v28 = vld [vmem:[%s750_s6 + $0x78] sm:$0xff]  ;;  %v361_v61 = vld [vmem:[%s753_s9 + $0x8] sm:$0xff] }
   0x8   :  { %541 = vmatpush3.bf16.msra.mxu1 %v540_v7  ;;  %v552_v20 = vpack.c.bf16 %v244_v19, %v243_v18  ;;  %v247_v24 = vld [vmem:[%s750_s6 + $0x60] sm:$0xff]  ;;  %v561_v29 = vpack.c.bf16 %v250_v28, %v249_v27  ;;  %v362_v63 = vld [vmem:[%s753_s9 + $0x10] sm:$0xff] }
   0x9   :  { %542 = vmatprep.subr.bf16.mxu1 %v580_v8  ;;  %v558_v26 = vpack.c.bf16 %v248_v25, %v247_v24  ;;  %v215_v51 = vld [vmem:[%s751_s4] sm:$0x1] }
   0xa   :  { %v453_v56 = vld [vmem:[%s752_s5] ss:$0 sm:$0xff] }
   0xb   :  { %491 = vmatmul.mubr.msk.f32.vlgmr.msra.gmra.mrb[0].mxu0 %vm120_vm4, %v38_v4  ;;  %v360_v60 = vld [vmem:[%s753_s9] sm:$0xff] }
   0xc   :  { %536 = vmatprep.mubr.msk.f32.mxu0 %vm579_vm2, %v578_v0  ;;  %544 = vmatpush3.bf16.msra.mxu1 %v543_v11  ;;  %v564_v62 = vpack.c.bf16 %v361_v61, %v360_v60  ;;  %v363_v0 = vld [vmem:[%s753_s9 + $0x18] sm:$0xff]  ;;  %v454_v27 = vld [vmem:[%s755_s8] ss:$0 sm:$0xff] }
   0xd   :  { %545 = vmatprep.subr.bf16.mxu1 %v580_v8  ;;  %v567_v1 = vpack.c.bf16 %v363_v0, %v362_v63 }
   0xe   :  { %565 = vmatpush3.bf16.msra.mxu0 %v564_v62 }
   0xf   :  { %566 = vmatprep.subr.bf16.mxu0 %v580_v8 }
  0x10   :  { %547 = vmatpush3.bf16.msra.mxu1 %v546_v14 }
  0x11   :  { %548 = vmatprep.subr.bf16.mxu1 %v580_v8 }
  0x12   :  { %568 = vmatpush3.bf16.msra.mxu0 %v567_v1 }
  0x14   :  { %550 = vmatpush3.bf16.msra.mxu1 %v549_v17 }
  0x15   :  { %551 = vmatprep.subr.bf16.mxu1 %v580_v8 }
  0x18   :  { %553 = vmatpush3.bf16.msra.mxu1 %v552_v20 }
  0x19   :  { %554 = vmatprep.subr.bf16.mxu1 %v580_v8 }
  0x1c   :  { %556 = vmatpush3.bf16.msra.mxu1 %v555_v23  ;;  %v340_v23 = vld [vmem:[%s754_s7] sm:$0x1] }
  0x1d   :  { %557 = vmatprep.subr.bf16.mxu1 %v580_v8 }
  0x20   :  { %559 = vmatpush3.bf16.msra.mxu1 %v558_v26 }
  0x21   :  { %560 = vmatprep.subr.bf16.mxu1 %v580_v8 }
  0x24   :  { %562 = vmatpush3.bf16.msra.mxu1 %v561_v29 }
  0xde   :  { %v194_v30 = vpop.f32.mrb[0].mxu0 }
  0xdf   :  { %v198_v31 = vrot.slane %v194_v30, 4  ;;  %v492_v32 = vpop.f32.mrb[1].mxu0 }
  0xe1   :  { %v199_v33 = vadd.f32 %v198_v31, %v194_v30  ;;  %v455_v31 = vld [vmem:[%s756_s10] ss:$0 sm:$0xff] }
  0xe3   :  { %v200_v34 = vrot.slane %v199_v33, 2 }
  0xe5   :  { %v201_v35 = vadd.f32 %v200_v34, %v199_v33 }
  0xe7   :  { %v202_v36 = vrot.slane %v201_v35, 1 }
  0xe9   :  { %v203_v37 = vadd.f32 %v202_v36, %v201_v35 }
  0xeb   :  { %v205_v38 = vmul.f32 0.125, %v203_v37 }
  0xed   :  { %v206_v39 = vsub.f32 %v194_v30, %v205_v38 }
  0xef   :  { %v207_v40 = vmul.f32 %v206_v39, %v206_v39 }
  0xf1   :  { %v208_v41 = vrot.slane %v207_v40, 4 }
  0xf3   :  { %v209_v42 = vadd.f32 %v208_v41, %v207_v40 }
  0xf5   :  { %v210_v43 = vrot.slane %v209_v42, 2 }
  0xf7   :  { %v211_v44 = vadd.f32 %v210_v43, %v209_v42 }
  0xf9   :  { %v212_v45 = vrot.slane %v211_v44, 1 }
  0xfb   :  { %v213_v46 = vadd.f32 %v212_v45, %v211_v44 }
  0xfd   :  { %v214_v47 = vmul.f32 0.125, %v213_v46 }
  0xff   :  { %v216_v48 = vadd.f32 1e-05, %v214_v47 }
 0x101   :  { %574 = vrsqrt.f32 %v216_v48 }
 0x10b   :  { %v575_v53 = vpop.eup %574 }
 0x10c   :  { %v218_v54 = vmul.f32 %v575_v53, %v215_v51 }
 0x10e   :  { %v223_v55 = vrot.slane %v218_v54, %v222_v52 }
 0x110   :  { %v225_v57 = vmul.f32 %v223_v55, %v206_v39 }
 0x112   :  { %v233_v58 = vadd.f32 %v453_v56, %v225_v57 }
 0x114   :  { %v234_v59 = vmax.f32 %v233_v58, 0.0 }
 0x116   :  { %526 = vmatmul.mubr.f32.vlgmr.msra.gmra.mrb[0].mxu1 %v234_v59 }
 0x1e9   :  { %v317_v2 = vpop.f32.mrb[0].mxu1 }
 0x1ea   :  { %v322_v3 = vsel %vm321_vm5, %v317_v2, 0.0  ;;  %v527_v4 = vpop.f32.mrb[1].mxu1 }
 0x1eb   :  { %v323_v5 = vrot.slane %v322_v3, 4 }
 0x1ed   :  { %v324_v6 = vadd.f32 %v323_v5, %v322_v3 }
 0x1ef   :  { %v325_v7 = vrot.slane %v324_v6, 2 }
 0x1f1   :  { %v326_v9 = vadd.f32 %v325_v7, %v324_v6 }
 0x1f3   :  { %v327_v8 = vrot.slane %v326_v9, 1 }
 0x1f5   :  { %v328_v10 = vadd.f32 %v327_v8, %v326_v9 }
 0x1f7   :  { %v329_v11 = vmul.f32 0.125, %v328_v10 }
 0x1f9   :  { %v330_v12 = vsub.f32 %v317_v2, %v329_v11 }
 0x1fb   :  { %v331_v13 = vmul.f32 %v330_v12, %v330_v12 }
 0x1fd   :  { %v332_v14 = vsel %vm321_vm5, %v331_v13, 0.0 }
 0x1fe   :  { %v333_v15 = vrot.slane %v332_v14, 4 }
 0x200   :  { %v334_v16 = vadd.f32 %v333_v15, %v332_v14 }
 0x202   :  { %v335_v17 = vrot.slane %v334_v16, 2 }
 0x204   :  { %v336_v18 = vadd.f32 %v335_v17, %v334_v16 }
 0x206   :  { %v337_v19 = vrot.slane %v336_v18, 1 }
 0x208   :  { %v338_v20 = vadd.f32 %v337_v19, %v336_v18 }
 0x20a   :  { %v339_v21 = vmul.f32 0.125, %v338_v20 }
 0x20c   :  { %v341_v22 = vadd.f32 1e-05, %v339_v21 }
 0x20e   :  { %576 = vrsqrt.f32 %v341_v22 }
 0x218   :  { %v577_v24 = vpop.eup %576 }
 0x219   :  { %v343_v25 = vmul.f32 %v577_v24, %v340_v23 }
 0x21b   :  { %v348_v26 = vrot.slane %v343_v25, %v222_v52 }
 0x21d   :  { %v350_v28 = vmul.f32 %v348_v26, %v330_v12 }
 0x21f   :  { %v358_v29 = vadd.f32 %v454_v27, %v350_v28 }
 0x221   :  { %v359_v30 = vmax.f32 %v358_v29, 0.0 }
 0x223   :  { %537 = vmatmul.mubr.msk.f32.vlgmr.msra.gmra.mrb[2].mxu0 %vm321_vm5, %v359_v30 }
 0x2f6   :  { %v440_v32 = vpop.f32.mrb[2].mxu0 }
 0x2f7   :  { %v441_v33 = vadd.f32 %v455_v31, %v440_v32  ;;  %v538_v34 = vpop.f32.mrb[3].mxu0 }
 0x2f9   :  { %444 = vst.msk [vmem:[%s757_s11] sm:$0xff] %vm42_vm1, %v441_v33 }

</bundles_post_ra>
